<compile_context>
chip_gen: v5e
topology: v5e:2x2
jax: 0.10.0
libtpu: 0.0.40
codegen_flags: <defaults>
</compile_context>

<pallas_src>
import jax
import jax.numpy as jnp
from jax.experimental import pallas as pl
from jax.experimental.pallas import tpu as pltpu


def _kernel_conv_body(ip_ref, kp_ref, iw_ref, kw_ref, opos_ref, ow_ref):
    """One grid step = one batch element x G output channels.

    Ref shapes inside the kernel:
      ip_ref:   (IC, IK, FK*D)    input positions, lane-tiled over fk
      kp_ref:   (G, IC, 1, FK*D)  filter positions for G output channels
      iw_ref:   (IC, IK, FK*W)    input weights, lane-tiled over fk
      kw_ref:   (G, IC, 1, FK*W)  filter weights for G output channels
      opos_ref: (G, IC, IK, FK*D) lane-dense output slab
      ow_ref:   (G, IC, IK, FK*W) lane-dense output slab
    """
    opos_ref[...] = (ip_ref[...][None, :, :, :] + kp_ref[...]).astype(opos_ref.dtype)
    ow_ref[...] = (iw_ref[...][None, :, :, :] * kw_ref[...]).astype(ow_ref.dtype)


def _vmem_info():
    """(block-buffer budget, physical VMEM) in bytes for the current chip."""
    try:
        vmem_cap = int(pltpu.get_tpu_info().vmem_capacity_bytes)
    except Exception:  # conservative fallback: v7x has 64 MiB per TensorCore
        vmem_cap = 64 * 1024 * 1024
    # ~half of physical VMEM for Pallas block buffers, minus compiler headroom;
    # cap at 48 MiB (plenty to hit HBM roofline with MB-scale slabs).
    budget = min(max(vmem_cap // 2 - (4 << 20), 8 << 20), 48 << 20)
    return budget, vmem_cap


def _pick_group(oc, batch, per_oc_bytes, fixed_bytes, budget_bytes, min_steps):
    """Largest divisor G of `oc` whose block buffers fit the budget, preferring
    choices that still expose >= min_steps grid steps (keeps both v7x
    TensorCores / the megacore fed)."""
    divisors = [g for g in range(1, oc + 1) if oc % g == 0]
    fitting = [g for g in divisors if fixed_bytes + g * per_oc_bytes <= budget_bytes]
    if not fitting:
        fitting = [1]
    enough = [g for g in fitting if batch * (oc // g) >= min_steps]
    pool = enough if enough else fitting
    return max(pool)


def prepare_kernel_conv_params(kernel_positions, kernel_weights):
    """One-time (module-init) relayout of the static filter parameters:
    (IC, OC, FK, X) -> (OC, IC, FK, X).  Hoisted out of the per-call path."""
    return (jnp.transpose(kernel_positions, (1, 0, 2, 3)),
            jnp.transpose(kernel_weights, (1, 0, 2, 3)))


def kernel_conv_forward(input_positions, input_weights,
                        kernel_positions_oc_first, kernel_weights_oc_first,
                        *, vmem_budget_bytes=None):
    """KernelConv.forward.

    input_positions:            (B, IC, IK, D)
    input_weights:              (B, IC, IK, W)
    kernel_positions_oc_first:  (OC, IC, FK, D)   (prepare_kernel_conv_params)
    kernel_weights_oc_first:    (OC, IC, FK, W)   (prepare_kernel_conv_params)
    returns (output_positions, output_weights):
      (B, OC, IC*IK*FK, D), (B, OC, IC*IK*FK, W)
    """
    B, IC, IK, D = input_positions.shape
    W = input_weights.shape[-1]
    OC, IC2, FK, D2 = kernel_positions_oc_first.shape
    assert IC2 == IC and D2 == D, (kernel_positions_oc_first.shape,
                                   input_positions.shape)
    assert input_weights.shape == (B, IC, IK, W)
    assert kernel_weights_oc_first.shape == (OC, IC, FK, W)

    # Preserve input precision end-to-end (bf16 in -> bf16 out).
    pos_dtype = jnp.result_type(input_positions.dtype,
                                kernel_positions_oc_first.dtype)
    w_dtype = jnp.result_type(input_weights.dtype, kernel_weights_oc_first.dtype)
    ps = jnp.dtype(pos_dtype).itemsize
    ws = jnp.dtype(w_dtype).itemsize

    FD, FW = FK * D, FK * W
    # TODO(synk): if FK*D or FK*W is not a multiple of 128, pad FK (or fold IK
    # into the lane dim) to keep the output stores unmasked vst.

    # Lane-tile the inputs over fk: ip_t[b, ic, ik, fk*D + d] = ip[b, ic, ik, d].
    # With allow_input_fusion these producers fuse into the pallas_call operand
    # pipeline, so the FK-times-expanded arrays are not materialized in HBM.
    ip_t = jnp.tile(input_positions.astype(pos_dtype), (1, 1, 1, FK))  # (B,IC,IK,FD)
    iw_t = jnp.tile(input_weights.astype(w_dtype), (1, 1, 1, FK))      # (B,IC,IK,FW)
    # Filter params: free reshape of the pre-transposed (OC-first) parameters.
    kp_t = kernel_positions_oc_first.astype(pos_dtype).reshape(OC, IC, 1, FD)
    kw_t = kernel_weights_oc_first.astype(w_dtype).reshape(OC, IC, 1, FW)

    # ---- VMEM budget -> G (output channels per grid step) -----------------
    if vmem_budget_bytes is None:
        budget, vmem_cap = _vmem_info()
    else:
        budget = vmem_budget_bytes
        _, vmem_cap = _vmem_info()
    in_block_bytes = IC * IK * (FD * ps + FW * ws)       # per-b input blocks
    filt_oc_bytes = IC * (FD * ps + FW * ws)             # per-oc filter blocks
    out_oc_bytes = IC * IK * (FD * ps + FW * ws)         # per-oc output blocks
    fixed_bytes = 2 * in_block_bytes                     # double-buffered
    per_oc_bytes = 2 * (filt_oc_bytes + out_oc_bytes)    # double-buffered
    min_steps = min(4, B * OC)
    G = _pick_group(OC, B, per_oc_bytes, fixed_bytes, budget, min_steps)
    n_g = OC // G
    needed = fixed_bytes + G * per_oc_bytes
    vmem_limit = int(min(vmem_cap, max(needed + (4 << 20), 32 << 20)))

    # ---- Grid-axis order by operand reuse ----------------------------------
    filt_total = OC * IC * (FD * ps + FW * ws)
    input_total = B * IC * IK * (FD * ps + FW * ws)
    extra_b_outer = 0 if n_g == 1 else (B - 1) * filt_total      # filter re-DMA
    extra_g_outer = 0 if B == 1 else (n_g - 1) * input_total     # input re-DMA
    b_outer = extra_b_outer <= extra_g_outer

    if b_outer:
        grid = (B, n_g)
        in_map = lambda b, g: (b, 0, 0, 0)
        filt_map = lambda b, g: (g, 0, 0, 0)
        out_map = lambda b, g: (b, g, 0, 0, 0)
    else:
        grid = (n_g, B)
        in_map = lambda g, b: (b, 0, 0, 0)
        filt_map = lambda g, b: (g, 0, 0, 0)
        out_map = lambda g, b: (b, g, 0, 0, 0)

    in_specs = [
        pl.BlockSpec((None, IC, IK, FD), in_map),
        pl.BlockSpec((G, IC, 1, FD), filt_map),
        pl.BlockSpec((None, IC, IK, FW), in_map),
        pl.BlockSpec((G, IC, 1, FW), filt_map),
    ]
    out_specs = [
        pl.BlockSpec((None, G, IC, IK, FD), out_map),
        pl.BlockSpec((None, G, IC, IK, FW), out_map),
    ]
    out_shape = [
        jax.ShapeDtypeStruct((B, OC, IC, IK, FD), pos_dtype),
        jax.ShapeDtypeStruct((B, OC, IC, IK, FW), w_dtype),
    ]

    out_elems = B * OC * IC * IK * FK
    cost = pl.CostEstimate(
        flops=out_elems * (D + W),
        transcendentals=0,
        bytes_accessed=int(input_total + filt_total
                           + out_elems * (D * ps + W * ws)),
    )

    opos, ow = pl.pallas_call(
        _kernel_conv_body,
        grid=grid,
        in_specs=in_specs,
        out_specs=out_specs,
        out_shape=out_shape,
        compiler_params=pltpu.CompilerParams(
            dimension_semantics=("parallel", "parallel"),
            vmem_limit_bytes=vmem_limit,
            allow_input_fusion=[True, False, True, False],
        ),
        cost_estimate=cost,
    )(ip_t, kp_t, iw_t, kw_t)

    # Free reshapes: (B, OC, IC, IK, FK*X) and (B, OC, IC*IK*FK, X) share the
    # same contiguous row-major layout, matching PyTorch's (ic, ik, fk) order.
    out_kernels = IC * IK * FK
    output_positions = opos.reshape(B, OC, out_kernels, D)
    output_weights = ow.reshape(B, OC, out_kernels, W)
    return output_positions, output_weights


def _reference_forward(ip, iw, kp, kw):
    """Pure-JAX transcription of the PyTorch forward (for validation)."""
    B, IC, IK, D = ip.shape
    _, OC, FK, _ = kp.shape
    W = iw.shape[-1]
    op = ip[:, :, None, :, None, :] + kp[None, :, :, None, :, :]   # (B,IC,OC,IK,FK,D)
    op = jnp.swapaxes(op, 1, 2).reshape(B, OC, IC * IK * FK, D)
    ow = iw[:, :, None, :, None, :] * kw[None, :, :, None, :, :]   # (B,IC,OC,IK,FK,W)
    ow = jnp.swapaxes(ow, 1, 2).reshape(B, OC, IC * IK * FK, W)
    return op, ow


if __name__ == "__main__":
    # Small shapes consistent with the module; FK*D == FK*W == 128 keeps the
    # output stores lane-dense (correctness does not depend on this).
    B, IC, OC, IK, FK, D, W = 2, 4, 8, 16, 64, 2, 2
    KERNEL_SPREAD = 1.0

    key = jax.random.PRNGKey(0)
    k1, k2, k3, k4 = jax.random.split(key, 4)
    input_positions = jax.random.normal(k1, (B, IC, IK, D), dtype=jnp.float32)
    input_weights = jax.random.normal(k2, (B, IC, IK, W), dtype=jnp.float32)
    # Module parameters (fixed_positions=False branch + kaiming-style init).
    kernel_positions = (2.0 * KERNEL_SPREAD *
                        jax.random.normal(k3, (IC, OC, FK, D), dtype=jnp.float32))
    kernel_weights = (jnp.sqrt(2.0 / (FK * W)) *
                      jax.random.normal(k4, (IC, OC, FK, W), dtype=jnp.float32))

    # One-time, module-init-style relayout of the static parameters.
    kp_prep, kw_prep = prepare_kernel_conv_params(kernel_positions, kernel_weights)

    out_pos, out_w = kernel_conv_forward(input_positions, input_weights,
                                         kp_prep, kw_prep)
    out_pos, out_w = jax.block_until_ready((out_pos, out_w))

    out_kernels = IC * IK * FK
    assert out_pos.shape == (B, OC, out_kernels, D), out_pos.shape
    assert out_w.shape == (B, OC, out_kernels, W), out_w.shape
    assert out_pos.dtype == input_positions.dtype
    assert out_w.dtype == input_weights.dtype

    ref_pos, ref_w = _reference_forward(input_positions, input_weights,
                                        kernel_positions, kernel_weights)
    assert jnp.allclose(out_pos, ref_pos, rtol=1e-5, atol=1e-5)
    assert jnp.allclose(out_w, ref_w, rtol=1e-5, atol=1e-5)

    print("KERNEL_OK")
</pallas_src>

<mosaic_0001>
module attributes {stable_mosaic.version = 11 : i64} {
  func.func @_kernel_conv_body(%arg0: i32, %arg1: i32, %arg2: memref<1x4x16x128xf32, #tpu.memory_space<vmem>>, %arg3: memref<4x4x1x128xf32, #tpu.memory_space<vmem>>, %arg4: memref<1x4x16x128xf32, #tpu.memory_space<vmem>>, %arg5: memref<4x4x1x128xf32, #tpu.memory_space<vmem>>, %arg6: memref<1x4x4x16x128xf32, #tpu.memory_space<vmem>>, %arg7: memref<1x4x4x16x128xf32, #tpu.memory_space<vmem>>) attributes {dimension_semantics = [#tpu.dimension_semantics<parallel>, #tpu.dimension_semantics<parallel>], iteration_bounds = array<i64: 2, 2>, scalar_prefetch = 0 : i64, scratch_operands = 0 : i64, tpu.core_type = #tpu.core_type<tc>, window_params = [{transform_indices = @transform_0, window_bounds = array<i64: 1, 4, 16, 128>}, {transform_indices = @transform_1, window_bounds = array<i64: 4, 4, 1, 128>}, {transform_indices = @transform_2, window_bounds = array<i64: 1, 4, 16, 128>}, {transform_indices = @transform_3, window_bounds = array<i64: 4, 4, 1, 128>}, {transform_indices = @transform_4, window_bounds = array<i64: 1, 4, 4, 16, 128>}, {transform_indices = @transform_5, window_bounds = array<i64: 1, 4, 4, 16, 128>}]} {
    %c0 = arith.constant 0 : index
    %c0_0 = arith.constant 0 : index
    %c0_1 = arith.constant 0 : index
    %c0_2 = arith.constant 0 : index
    %0 = vector.load %arg2[%c0, %c0_0, %c0_1, %c0_2] : memref<1x4x16x128xf32, #tpu.memory_space<vmem>>, vector<1x4x16x128xf32>
    %1 = vector.shape_cast %0 : vector<1x4x16x128xf32> to vector<4x16x128xf32>
    %2 = vector.shape_cast %1 : vector<4x16x128xf32> to vector<1x4x16x128xf32>
    %c0_3 = arith.constant 0 : index
    %c0_4 = arith.constant 0 : index
    %c0_5 = arith.constant 0 : index
    %c0_6 = arith.constant 0 : index
    %3 = vector.load %arg3[%c0_3, %c0_4, %c0_5, %c0_6] : memref<4x4x1x128xf32, #tpu.memory_space<vmem>>, vector<4x4x1x128xf32>
    %4 = vector.broadcast %2 : vector<1x4x16x128xf32> to vector<4x4x16x128xf32>
    %5 = vector.broadcast %3 : vector<4x4x1x128xf32> to vector<4x4x16x128xf32>
    %6 = arith.addf %4, %5 : vector<4x4x16x128xf32>
    %c0_7 = arith.constant 0 : index
    %c0_8 = arith.constant 0 : index
    %c0_9 = arith.constant 0 : index
    %c0_10 = arith.constant 0 : index
    %c0_11 = arith.constant 0 : index
    %7 = vector.load %arg6[%c0_7, %c0_8, %c0_9, %c0_10, %c0_11] : memref<1x4x4x16x128xf32, #tpu.memory_space<vmem>>, vector<1x4x4x16x128xf32>
    %8 = vector.shape_cast %7 : vector<1x4x4x16x128xf32> to vector<4x4x16x128xf32>
    %9 = vector.shape_cast %6 : vector<4x4x16x128xf32> to vector<1x4x4x16x128xf32>
    tpu.vector_store %arg6[%c0_7, %c0_8, %c0_9, %c0_10, %c0_11], %9 {strides = array<i32>} : memref<1x4x4x16x128xf32, #tpu.memory_space<vmem>>, vector<1x4x4x16x128xf32>,
    %c0_12 = arith.constant 0 : index
    %c0_13 = arith.constant 0 : index
    %c0_14 = arith.constant 0 : index
    %c0_15 = arith.constant 0 : index
    %10 = vector.load %arg4[%c0_12, %c0_13, %c0_14, %c0_15] : memref<1x4x16x128xf32, #tpu.memory_space<vmem>>, vector<1x4x16x128xf32>
    %11 = vector.shape_cast %10 : vector<1x4x16x128xf32> to vector<4x16x128xf32>
    %12 = vector.shape_cast %11 : vector<4x16x128xf32> to vector<1x4x16x128xf32>
    %c0_16 = arith.constant 0 : index
    %c0_17 = arith.constant 0 : index
    %c0_18 = arith.constant 0 : index
    %c0_19 = arith.constant 0 : index
    %13 = vector.load %arg5[%c0_16, %c0_17, %c0_18, %c0_19] : memref<4x4x1x128xf32, #tpu.memory_space<vmem>>, vector<4x4x1x128xf32>
    %14 = vector.broadcast %12 : vector<1x4x16x128xf32> to vector<4x4x16x128xf32>
    %15 = vector.broadcast %13 : vector<4x4x1x128xf32> to vector<4x4x16x128xf32>
    %16 = arith.mulf %14, %15 : vector<4x4x16x128xf32>
    %c0_20 = arith.constant 0 : index
    %c0_21 = arith.constant 0 : index
    %c0_22 = arith.constant 0 : index
    %c0_23 = arith.constant 0 : index
    %c0_24 = arith.constant 0 : index
    %17 = vector.load %arg7[%c0_20, %c0_21, %c0_22, %c0_23, %c0_24] : memref<1x4x4x16x128xf32, #tpu.memory_space<vmem>>, vector<1x4x4x16x128xf32>
    %18 = vector.shape_cast %17 : vector<1x4x4x16x128xf32> to vector<4x4x16x128xf32>
    %19 = vector.shape_cast %16 : vector<4x4x16x128xf32> to vector<1x4x4x16x128xf32>
    tpu.vector_store %arg7[%c0_20, %c0_21, %c0_22, %c0_23, %c0_24], %19 {strides = array<i32>} : memref<1x4x4x16x128xf32, #tpu.memory_space<vmem>>, vector<1x4x4x16x128xf32>,
    return
  }
  func.func @transform_0(%arg0: i32, %arg1: i32) -> (i32, i32, i32, i32) {
    %c0_i32 = arith.constant 0 : i32
    %c0_i32_0 = arith.constant 0 : i32
    %c0_i32_1 = arith.constant 0 : i32
    %c0_i32_2 = arith.constant 0 : i32
    return %arg0, %c0_i32, %c0_i32_0, %c0_i32_1 : i32, i32, i32, i32
  }
  func.func @transform_1(%arg0: i32, %arg1: i32) -> (i32, i32, i32, i32) {
    %c0_i32 = arith.constant 0 : i32
    %c0_i32_0 = arith.constant 0 : i32
    %c0_i32_1 = arith.constant 0 : i32
    %c0_i32_2 = arith.constant 0 : i32
    return %arg1, %c0_i32, %c0_i32_0, %c0_i32_1 : i32, i32, i32, i32
  }
  func.func @transform_2(%arg0: i32, %arg1: i32) -> (i32, i32, i32, i32) {
    %c0_i32 = arith.constant 0 : i32
    %c0_i32_0 = arith.constant 0 : i32
    %c0_i32_1 = arith.constant 0 : i32
    %c0_i32_2 = arith.constant 0 : i32
    return %arg0, %c0_i32, %c0_i32_0, %c0_i32_1 : i32, i32, i32, i32
  }
  func.func @transform_3(%arg0: i32, %arg1: i32) -> (i32, i32, i32, i32) {
    %c0_i32 = arith.constant 0 : i32
    %c0_i32_0 = arith.constant 0 : i32
    %c0_i32_1 = arith.constant 0 : i32
    %c0_i32_2 = arith.constant 0 : i32
    return %arg1, %c0_i32, %c0_i32_0, %c0_i32_1 : i32, i32, i32, i32
  }
  func.func @transform_4(%arg0: i32, %arg1: i32) -> (i32, i32, i32, i32, i32) {
    %c0_i32 = arith.constant 0 : i32
    %c0_i32_0 = arith.constant 0 : i32
    %c0_i32_1 = arith.constant 0 : i32
    %c0_i32_2 = arith.constant 0 : i32
    return %arg0, %arg1, %c0_i32, %c0_i32_0, %c0_i32_1 : i32, i32, i32, i32, i32
  }
  func.func @transform_5(%arg0: i32, %arg1: i32) -> (i32, i32, i32, i32, i32) {
    %c0_i32 = arith.constant 0 : i32
    %c0_i32_0 = arith.constant 0 : i32
    %c0_i32_1 = arith.constant 0 : i32
    %c0_i32_2 = arith.constant 0 : i32
    return %arg0, %arg1, %c0_i32, %c0_i32_0, %c0_i32_1 : i32, i32, i32, i32, i32
  }
}

</mosaic_0001>

<bundles_post_ra>
// kernel: tpu_custom_call.1
= control target key start
LH: loop header
LB: loop body
LE: loop exit
PB: predicated region body
PF: predicated region fallthrough
CT: control target
= control target key end

     0   :  { %s2034_s0 = inlined_call_operand.hbm [shape: f32[2,4,16,128], index: 0, kind: input, shape index: {}]   ;;  %s2035_s1 = inlined_call_operand.hbm [shape: f32[8,4,1,128], index: 1, kind: input, shape index: {}]   ;;  %s2036_s2 = inlined_call_operand.hbm [shape: f32[2,4,16,128], index: 2, kind: input, shape index: {}]   ;;  %s2037_s3 = inlined_call_operand.hbm [shape: f32[8,4,1,128], index: 3, kind: input, shape index: {}]   ;;  %s2038_s4 = inlined_call_operand.hbm [shape: f32[2,8,4,16,128], index: 4, kind: output, shape index: {0}]   ;;  %s2039_s5 = inlined_call_operand.hbm [shape: f32[2,8,4,16,128], index: 5, kind: output, shape index: {1}]  }
   0x1   :  { %2063 = sst [smem:[#allocation36_spill]] %s2034_s0 }
   0x2   :  { %2064 = sst [smem:[#allocation37_spill]] %s2035_s1 }
   0x3   :  { %2065 = sst [smem:[#allocation38_spill]] %s2038_s4 }
   0x4   :  { %2066 = sst [smem:[#allocation39_spill]] %s2039_s5 }
   0x5   :  { %11 = vsyncpa [#allocation3], 0 }
   0x6   :  { %13 = vsyncpa [#allocation3 + $0x1], 0 }
   0x7   :  { %14 = vsyncpa [#allocation6], 0 }
   0x8   :  { %16 = vsyncpa [#allocation6 + $0x1], 0 }
   0x9   :  { %17 = vsyncpa [#allocation9], 0 }
   0xa   :  { %19 = vsyncpa [#allocation9 + $0x1], 0 }
   0xb   :  { %20 = vsyncpa [#allocation4], 0 }
   0xc   :  { %22 = vsyncpa [#allocation4 + $0x1], 0 }
   0xd   :  { %23 = vsyncpa [#allocation12], 0 }
   0xe   :  { %25 = vsyncpa [#allocation12 + $0x1], 0  ;;  %s1477_s18 = smov 0   ;;  %s1479_s19 = smov 0  }
   0xf   :  { %s1481_s20 = smov 0   ;;  %s1483_s21 = smov 0  }
  0x10   :  { %s1485_s22 = smov 0   ;;  %s1487_s23 = smov 0  }
  0x11   :  { %s1489_s24 = smov 0   ;;  %s1491_s25 = smov 0  }
  0x12   :  { %s1493_s26 = smov 0   ;;  %s1495_s27 = smov 0  }
  0x13   :  { %s1497_s28 = smov 0   ;;  %s1499_s29 = smov 0  }
  0x14   :  { %s1501_s30 = smov 0   ;;  %s1503_s6 = smov 0  }
  0x15 LB: > { %2067 = sst [smem:[#allocation19_spill]] %s1387_s18  ;;  %s1546_s7 = sadd.s32 4294967295, %s1439_s6   ;;  %s1439_s6 = sphi %s1503_s6, %s31_s6   ;;  %s1435_s30 = sphi %s1501_s30, %s2124_s30   ;;  %s1431_s29 = sphi %s1499_s29, %s2130_s29   ;;  %s1427_s28 = sphi %s1497_s28, %s2122_s28   ;;  %s1423_s27 = sphi %s1495_s27, %s2129_s27   ;;  %s1419_s26 = sphi %s1493_s26, %s2121_s26   ;;  %s1415_s25 = sphi %s1491_s25, %s2128_s25   ;;  %s1411_s24 = sphi %s1489_s24, %s2127_s24   ;;  %s1407_s23 = sphi %s1487_s23, %s2126_s23   ;;  %s1403_s22 = sphi %s1485_s22, %s2125_s22   ;;  %s1399_s21 = sphi %s1483_s21, %s2118_s21   ;;  %s1395_s20 = sphi %s1481_s20, %s2117_s20   ;;  %s1391_s19 = sphi %s1479_s19, %s2116_s19   ;;  %s1387_s18 = sphi %s1477_s18, %s2115_s18  }
  0x16   : > { %2068 = sst [smem:[#allocation20_spill]] %s1391_s19  ;;  %s40_s8 = sadd.s32 1, %s1431_s29 }
  0x17   : > { %2069 = sst [smem:[#allocation21_spill]] %s1395_s20  ;;  %p1549_p0 = scmp.ge.s32.totalorder %s40_s8, 2 }
  0x18   : > { %2070 = sst [smem:[#allocation22_spill]] %s1403_s22  ;;  %p58_p1 = scmp.eq.s32.totalorder %s1439_s6, 0 }
  0x19   : > { %2071 = sst [smem:[#allocation23_spill]] %s1419_s26  ;;  %p64_p2 = scmp.eq.s32.totalorder %s1546_s7, 0 }
  0x1a   : > { %2072 = sst [smem:[#allocation24_spill]] %s1423_s27  ;;  %s76_s10 = sadd.s32 1, %s1407_s23 }
  0x1b   : > { %2073 = sst [smem:[#allocation25_spill]] %s1427_s28  ;;  %s2132_s8 = smov (%p1549_p0, %s40_s8), 0 }
  0x1c   : > { %2074 = sst [smem:[#allocation26_spill]] %s1435_s30  ;;  %p83_p3 = scmp.ne.s32.totalorder %s1407_s23, %s1403_s22 }
  0x1d   : > { %2075 = sst [smem:[#allocation27_spill]] %s1439_s6  ;;  %p89_p4 = scmp.ne.s32.totalorder %s1403_s22, %s1399_s21 }
  0x1e   : > { %2077 = sst [smem:[#allocation28_spill]] %s2132_s8  ;;  %s1565_s11 = ssub.s32 %s1431_s29, %s2132_s8 }
  0x1f   : > { %p74_p6 = scmp.eq.s32.totalorder %s1565_s11, 0  ;;  %p1571_p7 = por %p83_p3, %p58_p1 }
  0x20   : > { %p1577_p8 = por %p89_p4, %p64_p2  ;;  %p2045_p9 = scmp.lt.s32.totalorder %s1439_s6, 4 }
  0x21   : > { %s1582_s14 = scalar_select %p74_p6, %s1407_s23, %s76_s10  }
  0x22   : > { %s2079_s13 = scalar_select %p1577_p8, 1, 0 }
  0x23   : > { %2081 = sst [smem:[#allocation30_spill]] %s1582_s14  ;;  %s243_s15 = sand.u32 1, %s1439_s6  }
  0x24   : > { %2080 = sst [smem:[#allocation29_spill]] %s2079_s13  ;;  %s2043_s16 = sand.u32 1, %s1407_s23  }
  0x25   : > { %s1589_s17 = sshll.u32 %s2043_s16, 4  ;;  %s2044_s21 = sshll.u32 %s1431_s29, 4 }
  0x26   : > { %s2082_s1 = sld [smem:[#allocation37_spill]]  ;;  %s247_s10 = scalar_lea.vmem [#allocation5], %s1589_s17 }
  0x27   : > { %s255_s14 = sshll.u32 %s247_s10, 4  ;;  %p1602_p10 = pnand %p2045_p9, %p1571_p7  ;;  %s256_s14 = int_to_ptr.vmem [resolvable:$true] %s255_s14 }
  0x28   : > { %p920_p11 = scmp.ge.s32.totalorder %s1439_s6, 1  ;;  %p307_p12 = scmp.lt.s32.totalorder %s1439_s6, 5 }
  0x29   : > { %s2047_s5 = smov 16   ;;  %s2048_s8 = smov 1  }
  0x2a   : > { %p1616_p13 = pnand %p920_p11, %p307_p12  ;;  %s905_s10 = sadd.s32 4294967294, %s1439_s6  }
  0x2b   : > { %p57_p3 = scmp.ne.s32.totalorder %s1419_s26, %s1415_s25  ;;  %p63_p4 = scmp.ne.s32.totalorder %s1415_s25, %s1411_s24 }
  0x2c   : > { %s252_s4 = scalar_lea.hbm %s2082_s1, %s2044_s21  ;;  %s50_s21 = sadd.s32 1, %s1419_s26 }
  0x2d   : > { %s253_s28 = sshll.u32 %s252_s4, 4  ;;  %s1608_s4 = scalar_lea.sflag [#allocation6], %s243_s15  ;;  %s254_s28 = int_to_ptr.hbm [resolvable:$true] %s253_s28 }
  0x2e   : > { %963 = dma.hbm_to_vmem [thread:$0]  (!%p1602_p10), %s254_s28, 256, %s256_s14, %s1608_s4, %s2047_s5, %s2047_s5, %s2048_s8  }
  0x2f   : > { %s43_s15 = sadd.s32 1, %s1435_s30  ;;  %s156_s1 = sadd.s32 1, %s1395_s20 }
  0x30   : > { %s2134_s15 = smov (!%p1549_p0, %s43_s15), %s1435_s30  ;;  %p1633_p7 = por %p58_p1, %p57_p3 }
  0x31   : > { %p45_p6 = scmp.ge.s32.totalorder %s2134_s15, 2  ;;  %p1639_p11 = por %p64_p2, %p63_p4 }
  0x32   : > { %p166_p0 = scmp.ne.s32.totalorder %s1395_s20, %s1391_s19  ;;  %p172_p12 = scmp.ne.s32.totalorder %s1391_s19, %s1387_s18 }
  0x33   : > { %s2136_s15 = smov (%p45_p6, %s2134_s15), 0  ;;  %p173_p9 = scmp.eq.s32.totalorder %s905_s10, 3 }
  0x34   : > { %2087 = sst [smem:[#allocation31_spill]] %s2136_s15  ;;  %s47_s24 = ssub.s32 %s1435_s30, %s2136_s15 }
  0x35   : > { %p48_p5 = scmp.eq.s32.totalorder %s47_s24, 0  ;;  %s153_s9 = sor.u32 %s1565_s11, %s47_s24 }
  0x36   : > { %p154_p1 = scmp.eq.s32.totalorder %s153_s9, 0  ;;  %p2088_p3 = scmp.eq.s32.totalorder %s1546_s7, 3 }
  0x37   : > { %s1659_s8 = scalar_select %p48_p5, %s1419_s26, %s50_s21  }
  0x38   : > { %p1654_p8 = por %p2088_p3, %p166_p0  ;;  %p1664_p2 = por %p173_p9, %p172_p12 }
  0x39   : > { %2091 = sst [smem:[#allocation33_spill]] %s1659_s8  ;;  %s221_s15 = sand.u32 1, %s1419_s26  }
  0x3a   : > { %s2089_s5 = scalar_select %p1654_p8, 1, 0 }
  0x3b   : > { %s1662_s27 = scalar_select %p154_p1, %s1395_s20, %s156_s1  }
  0x3c   : > { %2090 = sst [smem:[#allocation32_spill]] %s2089_s5  ;;  %s908_s10 = sshll.u32 %s221_s15, 6 }
  0x3d   : > { %2092 = sst [smem:[#allocation34_spill]] %s1662_s27  ;;  %s939_s18 = sshll.u32 %s1435_s30, 6 }
  0x3e   : > { %s2093_s13 = scalar_select %p1664_p2, 1, 0 }
  0x3f   : > { %s2095_s0 = sld [smem:[#allocation36_spill]]  ;;  %s225_s24 = scalar_lea.vmem [#allocation2], %s908_s10 }
  0x40   : > { %2094 = sst [smem:[#allocation35_spill]] %s2093_s13  ;;  %s233_s9 = sshll.u32 %s225_s24, 4  ;;  %s234_s9 = int_to_ptr.vmem [resolvable:$true] %s233_s9 }
  0x41   : > { %p2096_p5 = scmp.lt.s32.totalorder %s1439_s6, 4  ;;  %s222_s1 = scalar_lea.sflag [#allocation3], %s221_s15 }
  0x42   : > { %s1443_s21 = smov 128   ;;  %s1444_s8 = smov 8  }
  0x43   : > { %p958_p9 = pnand %p2096_p5, %p1633_p7  ;;  %s274_s22 = scalar_lea.hbm %s2036_s2, %s939_s18 }
  0x44   : > { %s275_s26 = sshll.u32 %s274_s22, 4  ;;  %s291_s13 = scalar_lea.vmem [#allocation8], %s1589_s17  ;;  %s276_s26 = int_to_ptr.hbm [resolvable:$true] %s275_s26 }
  0x45   : > { %s230_s11 = scalar_lea.hbm %s2095_s0, %s939_s18  ;;  %s269_s0 = scalar_lea.vmem [#allocation7], %s908_s10 }
  0x46   : > { %s231_s5 = sshll.u32 %s230_s11, 4  ;;  %s277_s24 = sshll.u32 %s269_s0, 4  ;;  %s232_s5 = int_to_ptr.hbm [resolvable:$true] %s231_s5  ;;  %s278_s24 = int_to_ptr.vmem [resolvable:$true] %s277_s24 }
  0x47   : > { %960 = dma.hbm_to_vmem [thread:$0]  (!%p958_p9), %s232_s5, 1024, %s234_s9, %s222_s1, %s1443_s21, %s1443_s21, %s1444_s8  }
  0x48   : > { %966 = dma.hbm_to_vmem [thread:$0]  (!%p958_p9), %s276_s26, 1024, %s278_s24, %s1608_s4, %s1443_s21, %s1443_s21, %s1444_s8  }
  0x49   : > { %s2097_s11 = sshll.u32 %s1431_s29, 4  ;;  %s299_s6 = sshll.u32 %s291_s13, 4  ;;  %s300_s6 = int_to_ptr.vmem [resolvable:$true] %s299_s6 }
  0x4a   : > { %s296_s15 = scalar_lea.hbm %s2037_s3, %s2097_s11  ;;  %s2098_s5 = sand.u32 1, %s1407_s23  }
  0x4b   : > { %s297_s20 = sshll.u32 %s296_s15, 4  ;;  %s288_s9 = scalar_lea.sflag [#allocation9], %s2098_s5  ;;  %s298_s20 = int_to_ptr.hbm [resolvable:$true] %s297_s20 }
  0x4c   : > { %s2099_s18 = smov 1   ;;  %s2100_s30 = smov 16  }
  0x4d   : > { %969 = dma.hbm_to_vmem [thread:$0]  (!%p1602_p10), %s298_s20, 256, %s300_s6, %s288_s9, %s2100_s30, %s2100_s30, %s2099_s18  }
  0x4e   : > { %311 = sbr.rel (%p1616_p13) target bundleno = 186 (0xba), region = 36  ;;  %s313_s0 = sand.u32 (!%p1616_p13), 1, %s1415_s25  }
  0x4f   : > { %s921_s26 = sshll.u32 (!%p1616_p13), %s313_s0, 6  ;;  %s314_s27 = scalar_lea.sflag (!%p1616_p13), [#allocation3], %s313_s0 }
  0x50   : > { %s1697_s4 = scalar_lea.vmem (!%p1616_p13), [#allocation2], %s921_s26 }
  0x53   : > { %1362 = dma.done.wait (%p1639_p11), %s314_s27, 1024  }
  0x54   : > { %1364 = vsyncadd (%p1639_p11), %s314_s27, 4294966272  ;;  %s2101_s13 = sld [smem:[#allocation22_spill]]  ;;  %s323_s17 = sand.u32 1, %s1546_s7  }
  0x55   : > { %s2102_s16 = sld [smem:[#allocation29_spill]]  ;;  %s324_s8 = scalar_lea.sflag [#allocation6], %s323_s17 }
  0x5a   : > { %s325_s20 = sand.u32 1, %s2101_s13  }
  0x5b   : > { %s922_s6 = sshll.u32 %s325_s20, 4  ;;  %p2103_p10 = scmp.ne.s32.totalorder %s2102_s16, 0 }
  0x5c   : > { %s1705_s12 = scalar_lea.vmem [#allocation5], %s922_s6 }
  0x5d   : > { %1366 = dma.done.wait (%p2103_p10), %s324_s8, 256  }
  0x5e   : > { %1368 = vsyncadd (%p2103_p10), %s324_s8, 4294967040  ;;  %s1711_s10 = scalar_lea.vmem [#allocation7], %s921_s26 }
  0x5f   : > { %1370 = dma.done.wait (%p1639_p11), %s324_s8, 1024  }
  0x60   : > { %1372 = vsyncadd (%p1639_p11), %s324_s8, 4294966272  ;;  %s344_s7 = scalar_lea.sflag [#allocation9], %s325_s20  ;;  %s1717_s1 = scalar_lea.vmem [#allocation8], %s922_s6 }
  0x61   : > { %1374 = dma.done.wait (%p2103_p10), %s344_s7, 256  }
  0x62   : > { %1376 = vsyncadd (%p2103_p10), %s344_s7, 4294967040  ;;  %s2104_s21 = sld [smem:[#allocation20_spill]]  ;;  %v1728_v0 = vld [vmem:[%s1697_s4] sm:$0xff]  ;;  %v1732_v2 = vld [vmem:[%s1697_s4 + $0x8] sm:$0xff] }
  0x63   : > { %v1097_v1 = vld [vmem:[%s1705_s12] ss:$0 sm:$0xff]  ;;  %v1098_v6 = vld [vmem:[%s1705_s12 + $0x1] ss:$0 sm:$0xff]  ;;  %v1741_v7 = vld [vmem:[%s1697_s4 + $0x18] sm:$0xff]  ;;  %s2105_s11 = sld [smem:[#allocation24_spill]] }
  0x64   : > { %v1735_v3 = vld [vmem:[%s1697_s4 + $0x10] sm:$0xff]  ;;  %v471_v4 = vadd.f32 %v1097_v1, %v1728_v0  ;;  %v472_v5 = vadd.f32 %v1097_v1, %v1732_v2  ;;  %v1744_v8 = vld [vmem:[%s1697_s4 + $0x20] sm:$0xff]  ;;  %v1748_v10 = vld [vmem:[%s1697_s4 + $0x28] sm:$0xff]  ;;  %v474_v12 = vadd.f32 %v1098_v6, %v1741_v7  ;;  %s2106_s28 = sld [smem:[#allocation25_spill]] }
  0x65   : > { %v1099_v9 = vld [vmem:[%s1705_s12 + $0x2] ss:$0 sm:$0xff]  ;;  %v473_v11 = vadd.f32 %v1098_v6, %v1735_v3  ;;  %v1100_v14 = vld [vmem:[%s1705_s12 + $0x3] ss:$0 sm:$0xff]  ;;  %v1765_v17 = vld [vmem:[%s1697_s4 + $0x38] sm:$0xff]  ;;  %s2107_s26 = sld [smem:[#allocation38_spill]] }
  0x66   : > { %v1758_v13 = vld [vmem:[%s1697_s4 + $0x30] sm:$0xff]  ;;  %v475_v15 = vadd.f32 %v1099_v9, %v1744_v8  ;;  %v476_v16 = vadd.f32 %v1099_v9, %v1748_v10  ;;  %v478_v21 = vadd.f32 %v1100_v14, %v1765_v17  ;;  %v1105_v29 = vld [vmem:[%s1705_s12 + $0x8] ss:$0 sm:$0xff]  ;;  %v1106_v32 = vld [vmem:[%s1705_s12 + $0x9] ss:$0 sm:$0xff]  ;;  %s2109_s17 = sld [smem:[#allocation39_spill]] }
  0x67   : > { %v1101_v18 = vld [vmem:[%s1705_s12 + $0x4] ss:$0 sm:$0xff]  ;;  %v477_v19 = vadd.f32 %v1100_v14, %v1758_v13  ;;  %v1102_v20 = vld [vmem:[%s1705_s12 + $0x5] ss:$0 sm:$0xff]  ;;  %v1103_v23 = vld [vmem:[%s1705_s12 + $0x6] ss:$0 sm:$0xff]  ;;  %v487_v34 = vadd.f32 %v1105_v29, %v1728_v0  ;;  %v488_v36 = vadd.f32 %v1105_v29, %v1732_v2  ;;  %v489_v37 = vadd.f32 %v1106_v32, %v1735_v3 }
  0x68   : > { %s1724_s14 = sand.u32 1, %s2104_s21   ;;  %v479_v22 = vadd.f32 %v1101_v18, %v1728_v0  ;;  %v480_v24 = vadd.f32 %v1101_v18, %v1732_v2  ;;  %v481_v25 = vadd.f32 %v1102_v20, %v1735_v3  ;;  %v1104_v26 = vld [vmem:[%s1705_s12 + $0x7] ss:$0 sm:$0xff]  ;;  %v482_v27 = vadd.f32 %v1102_v20, %v1741_v7  ;;  %v1107_v35 = vld [vmem:[%s1705_s12 + $0xa] ss:$0 sm:$0xff] }
  0x69   : > { %s925_s19 = sshll.u32 %s1724_s14, 8  ;;  %v483_v28 = vadd.f32 %v1103_v23, %v1744_v8  ;;  %v484_v30 = vadd.f32 %v1103_v23, %v1748_v10  ;;  %v485_v31 = vadd.f32 %v1104_v26, %v1758_v13  ;;  %v486_v33 = vadd.f32 %v1104_v26, %v1765_v17  ;;  %v1108_v38 = vld [vmem:[%s1705_s12 + $0xb] ss:$0 sm:$0xff]  ;;  %v1109_v41 = vld [vmem:[%s1705_s12 + $0xc] ss:$0 sm:$0xff]  ;;  %v1829_v55 = vld [vmem:[%s1711_s10] sm:$0xff] }
  0x6a   : > { %s1752_s22 = scalar_lea.vmem [#allocation10], %s925_s19  ;;  %v490_v39 = vadd.f32 %v1106_v32, %v1741_v7  ;;  %v491_v40 = vadd.f32 %v1107_v35, %v1744_v8  ;;  %v492_v42 = vadd.f32 %v1107_v35, %v1748_v10  ;;  %v493_v43 = vadd.f32 %v1108_v38, %v1758_v13  ;;  %v1110_v44 = vld [vmem:[%s1705_s12 + $0xd] ss:$0 sm:$0xff]  ;;  %v1111_v47 = vld [vmem:[%s1705_s12 + $0xe] ss:$0 sm:$0xff]  ;;  %v1840_v60 = vld [vmem:[%s1711_s10 + $0x10] sm:$0xff] }
  0x6b   : > { %503 = vst [vmem:[%s1752_s22] sm:$0xff] %v471_v4  ;;  %v494_v45 = vadd.f32 %v1108_v38, %v1765_v17  ;;  %v495_v46 = vadd.f32 %v1109_v41, %v1728_v0  ;;  %v496_v48 = vadd.f32 %v1109_v41, %v1732_v2  ;;  %v497_v49 = vadd.f32 %v1110_v44, %v1735_v3  ;;  %v1112_v50 = vld [vmem:[%s1705_s12 + $0xf] ss:$0 sm:$0xff]  ;;  %v1113_v53 = vld [vmem:[%s1717_s1] ss:$0 sm:$0xff]  ;;  %v1114_v58 = vld [vmem:[%s1717_s1 + $0x1] ss:$0 sm:$0xff]  ;;  %s2108_s4 = smov %s2107_s26 }
  0x6c   : > { %504 = vst [vmem:[%s1752_s22 + $0x8] sm:$0xff] %v472_v5  ;;  %v498_v51 = vadd.f32 %v1110_v44, %v1741_v7  ;;  %v499_v52 = vadd.f32 %v1111_v47, %v1744_v8  ;;  %v500_v54 = vadd.f32 %v1111_v47, %v1748_v10  ;;  %v501_v56 = vadd.f32 %v1112_v50, %v1758_v13  ;;  %v1834_v57 = vld [vmem:[%s1711_s10 + $0x8] sm:$0xff]  ;;  %v1845_v62 = vld [vmem:[%s1711_s10 + $0x18] sm:$0xff]  ;;  %v1115_v63 = vld [vmem:[%s1717_s1 + $0x2] ss:$0 sm:$0xff]  ;;  %s1866_s24 = scalar_lea.vmem [#allocation11], %s925_s19 }
  0x6d   : > { %505 = vst [vmem:[%s1752_s22 + $0x10] sm:$0xff] %v473_v11  ;;  %v502_v59 = vadd.f32 %v1112_v50, %v1765_v17  ;;  %v607_v61 = vmul.f32 %v1113_v53, %v1829_v55  ;;  %v608_v0 = vmul.f32 %v1113_v53, %v1834_v57  ;;  %v1851_v1 = vld [vmem:[%s1711_s10 + $0x20] sm:$0xff]  ;;  %v609_v2 = vmul.f32 %v1114_v58, %v1840_v60  ;;  %v1856_v3 = vld [vmem:[%s1711_s10 + $0x28] sm:$0xff]  ;;  %v1862_v6 = vld [vmem:[%s1711_s10 + $0x30] sm:$0xff]  ;;  %s943_s15 = sshll.u32 %s2105_s11, 5  ;;  %s931_s5 = sshll.u32 %s2106_s28, 6 }
  0x6e   : > { %506 = vst [vmem:[%s1752_s22 + $0x18] sm:$0xff] %v474_v12  ;;  %v1116_v4 = vld [vmem:[%s1717_s1 + $0x3] ss:$0 sm:$0xff]  ;;  %v610_v5 = vmul.f32 %v1114_v58, %v1845_v62  ;;  %v611_v7 = vmul.f32 %v1115_v63, %v1851_v1  ;;  %v1871_v8 = vld [vmem:[%s1711_s10 + $0x38] sm:$0xff]  ;;  %v1117_v9 = vld [vmem:[%s1717_s1 + $0x4] ss:$0 sm:$0xff]  ;;  %v612_v10 = vmul.f32 %v1115_v63, %v1856_v3  ;;  %s689_s9 = sadd.s32 %s943_s15, %s931_s5 }
  0x6f   : > { %507 = vst [vmem:[%s1752_s22 + $0x20] sm:$0xff] %v475_v15  ;;  %v613_v11 = vmul.f32 %v1116_v4, %v1862_v6  ;;  %v1118_v12 = vld [vmem:[%s1717_s1 + $0x5] ss:$0 sm:$0xff]  ;;  %v614_v13 = vmul.f32 %v1116_v4, %v1871_v8  ;;  %v615_v14 = vmul.f32 %v1117_v9, %v1829_v55  ;;  %v1119_v15 = vld [vmem:[%s1717_s1 + $0x6] ss:$0 sm:$0xff]  ;;  %s932_s18 = sshll.u32 %s689_s9, 3 }
  0x70   : > { %508 = vst [vmem:[%s1752_s22 + $0x28] sm:$0xff] %v476_v16  ;;  %v616_v16 = vmul.f32 %v1117_v9, %v1834_v57  ;;  %v617_v17 = vmul.f32 %v1118_v12, %v1840_v60  ;;  %v1120_v18 = vld [vmem:[%s1717_s1 + $0x7] ss:$0 sm:$0xff]  ;;  %v619_v20 = vmul.f32 %v1119_v15, %v1851_v1  ;;  %s691_s27 = scalar_lea.hbm %s2107_s26, %s932_s18  ;;  %s711_s20 = scalar_lea.hbm %s2109_s17, %s932_s18 }
  0x71   : > { %509 = vst [vmem:[%s1752_s22 + $0x30] sm:$0xff] %v477_v19  ;;  %v618_v19 = vmul.f32 %v1118_v12, %v1845_v62  ;;  %v621_v23 = vmul.f32 %v1120_v18, %v1862_v6  ;;  %s692_s6 = sshll.u32 %s1752_s22, 4  ;;  %s694_s8 = sshll.u32 %s691_s27, 4  ;;  %s693_s6 = int_to_ptr.vmem [resolvable:$true] %s692_s6  ;;  %s695_s8 = int_to_ptr.hbm [resolvable:$true] %s694_s8 }
  0x72   : > { %510 = vst [vmem:[%s1752_s22 + $0x38] sm:$0xff] %v478_v21  ;;  %v1121_v21 = vld [vmem:[%s1717_s1 + $0x8] ss:$0 sm:$0xff]  ;;  %s712_s10 = sshll.u32 %s1866_s24, 4  ;;  %s714_s7 = sshll.u32 %s711_s20, 4  ;;  %s1952_s10 = int_to_ptr.vmem [resolvable:$true] %s712_s10  ;;  %s1954_s7 = int_to_ptr.hbm [resolvable:$true] %s714_s7 }
  0x73   : > { %511 = vst [vmem:[%s1752_s22 + $0x40] sm:$0xff] %v479_v22  ;;  %v620_v22 = vmul.f32 %v1119_v15, %v1856_v3  ;;  %v623_v26 = vmul.f32 %v1121_v21, %v1829_v55  ;;  %s1263_s21 = sshra.s32 %s695_s8, 4  ;;  %s1269_s28 = scalar_lea.hbm %s2108_s4, 1024  ;;  %s1264_s21 = int_to_ptr.hbm [resolvable:$true] %s1263_s21 }
  0x74   : > { %512 = vst [vmem:[%s1752_s22 + $0x48] sm:$0xff] %v480_v24  ;;  %v1122_v24 = vld [vmem:[%s1717_s1 + $0x9] ss:$0 sm:$0xff]  ;;  %s1265_s19 = scalar_lea.hbm %s1264_s21, 256  ;;  %p1270_p7 = scmp.lt.s32.totalorder %s1264_s21, %s2108_s4 }
  0x75   : > { %513 = vst [vmem:[%s1752_s22 + $0x50] sm:$0xff] %v481_v25  ;;  %v622_v25 = vmul.f32 %v1120_v18, %v1871_v8  ;;  %v625_v29 = vmul.f32 %v1122_v24, %v1840_v60  ;;  %p1266_p13 = scmp.ne.s32.totalorder %s1264_s21, %s1265_s19  ;;  %p1271_p11 = scmp.lt.s32.totalorder %s1269_s28, %s1265_s19 }
  0x76   : > { %514 = vst [vmem:[%s1752_s22 + $0x58] sm:$0xff] %v482_v27  ;;  %v1123_v27 = vld [vmem:[%s1717_s1 + $0xa] ss:$0 sm:$0xff] }
  0x77   : > { %515 = vst [vmem:[%s1752_s22 + $0x60] sm:$0xff] %v483_v28  ;;  %v624_v28 = vmul.f32 %v1121_v21, %v1834_v57  ;;  %v627_v32 = vmul.f32 %v1123_v27, %v1851_v1  ;;  %p1267_p4 = pnand %p1266_p13, %p1654_p8  ;;  %p1272_p0 = por %p1271_p11, %p1270_p7 }
  0x78   : > { %516 = vst [vmem:[%s1752_s22 + $0x68] sm:$0xff] %v484_v30  ;;  %v1124_v30 = vld [vmem:[%s1717_s1 + $0xb] ss:$0 sm:$0xff] }
  0x79   : > { %517 = vst [vmem:[%s1752_s22 + $0x70] sm:$0xff] %v485_v31  ;;  %v626_v31 = vmul.f32 %v1122_v24, %v1845_v62  ;;  %v629_v35 = vmul.f32 %v1124_v30, %v1862_v6  ;;  %p1268_p6 = pneg %p1267_p4 }
  0x7a   : > { %518 = vst [vmem:[%s1752_s22 + $0x78] sm:$0xff] %v486_v33  ;;  %v1125_v33 = vld [vmem:[%s1717_s1 + $0xc] ss:$0 sm:$0xff] }
  0x7b   : > { %519 = vst [vmem:[%s1752_s22 + $0x80] sm:$0xff] %v487_v34  ;;  %v628_v34 = vmul.f32 %v1123_v27, %v1856_v3  ;;  %v631_v38 = vmul.f32 %v1125_v33, %v1829_v55  ;;  %p1273_p12 = pnand %p1272_p0, %p1268_p6 }
  0x7c   : > { %520 = vst [vmem:[%s1752_s22 + $0x88] sm:$0xff] %v488_v36  ;;  %v1126_v36 = vld [vmem:[%s1717_s1 + $0xd] ss:$0 sm:$0xff] }
  0x7d   : > { %521 = vst [vmem:[%s1752_s22 + $0x90] sm:$0xff] %v489_v37  ;;  %v630_v37 = vmul.f32 %v1124_v30, %v1871_v8  ;;  %v633_v41 = vmul.f32 %v1126_v36, %v1840_v60 }
  0x7e   : > { %522 = vst [vmem:[%s1752_s22 + $0x98] sm:$0xff] %v490_v39  ;;  %v1127_v39 = vld [vmem:[%s1717_s1 + $0xe] ss:$0 sm:$0xff] }
  0x7f   : > { %523 = vst [vmem:[%s1752_s22 + $0xa0] sm:$0xff] %v491_v40  ;;  %v632_v40 = vmul.f32 %v1125_v33, %v1834_v57  ;;  %v635_v44 = vmul.f32 %v1127_v39, %v1851_v1 }
  0x80   : > { %524 = vst [vmem:[%s1752_s22 + $0xa8] sm:$0xff] %v492_v42  ;;  %v1128_v42 = vld [vmem:[%s1717_s1 + $0xf] ss:$0 sm:$0xff]  ;;  %s672_s1 = scalar_lea.sflag [#allocation4], %s1724_s14 }
  0x81   : > { %525 = vst [vmem:[%s1752_s22 + $0xb0] sm:$0xff] %v493_v43  ;;  %v634_v43 = vmul.f32 %v1126_v36, %v1845_v62  ;;  %v638_v47 = vmul.f32 %v1128_v42, %v1871_v8 }
  0x82   : > { %526 = vst [vmem:[%s1752_s22 + $0xb8] sm:$0xff] %v494_v45  ;;  %v636_v45 = vmul.f32 %v1127_v39, %v1856_v3 }
  0x83   : > { %527 = vst [vmem:[%s1752_s22 + $0xc0] sm:$0xff] %v495_v46  ;;  %v637_v46 = vmul.f32 %v1128_v42, %v1862_v6 }
  0x84   : > { %528 = vst [vmem:[%s1752_s22 + $0xc8] sm:$0xff] %v496_v48 }
  0x85   : > { %529 = vst [vmem:[%s1752_s22 + $0xd0] sm:$0xff] %v497_v49 }
  0x86   : > { %530 = vst [vmem:[%s1752_s22 + $0xd8] sm:$0xff] %v498_v51 }
  0x87   : > { %531 = vst [vmem:[%s1752_s22 + $0xe0] sm:$0xff] %v499_v52 }
  0x88   : > { %532 = vst [vmem:[%s1752_s22 + $0xe8] sm:$0xff] %v500_v54 }
  0x89   : > { %533 = vst [vmem:[%s1752_s22 + $0xf0] sm:$0xff] %v501_v56 }
  0x8a   : > { %534 = vst [vmem:[%s1752_s22 + $0xf8] sm:$0xff] %v502_v59 }
  0x8b   : > { %639 = vst [vmem:[%s1866_s24] sm:$0xff] %v607_v61 }
  0x8c   : > { %640 = vst [vmem:[%s1866_s24 + $0x8] sm:$0xff] %v608_v0 }
  0x8d   : > { %641 = vst [vmem:[%s1866_s24 + $0x10] sm:$0xff] %v609_v2 }
  0x8e   : > { %642 = vst [vmem:[%s1866_s24 + $0x18] sm:$0xff] %v610_v5 }
  0x8f   : > { %643 = vst [vmem:[%s1866_s24 + $0x20] sm:$0xff] %v611_v7 }
  0x90   : > { %644 = vst [vmem:[%s1866_s24 + $0x28] sm:$0xff] %v612_v10 }
  0x91   : > { %645 = vst [vmem:[%s1866_s24 + $0x30] sm:$0xff] %v613_v11 }
  0x92   : > { %646 = vst [vmem:[%s1866_s24 + $0x38] sm:$0xff] %v614_v13 }
  0x93   : > { %647 = vst [vmem:[%s1866_s24 + $0x40] sm:$0xff] %v615_v14 }
  0x94   : > { %648 = vst [vmem:[%s1866_s24 + $0x48] sm:$0xff] %v616_v16 }
  0x95   : > { %649 = vst [vmem:[%s1866_s24 + $0x50] sm:$0xff] %v617_v17 }
  0x96   : > { %650 = vst [vmem:[%s1866_s24 + $0x58] sm:$0xff] %v618_v19 }
  0x97   : > { %651 = vst [vmem:[%s1866_s24 + $0x60] sm:$0xff] %v619_v20 }
  0x98   : > { %652 = vst [vmem:[%s1866_s24 + $0x68] sm:$0xff] %v620_v22 }
  0x99   : > { %653 = vst [vmem:[%s1866_s24 + $0x70] sm:$0xff] %v621_v23 }
  0x9a   : > { %654 = vst [vmem:[%s1866_s24 + $0x78] sm:$0xff] %v622_v25 }
  0x9b   : > { %655 = vst [vmem:[%s1866_s24 + $0x80] sm:$0xff] %v623_v26 }
  0x9c   : > { %656 = vst [vmem:[%s1866_s24 + $0x88] sm:$0xff] %v624_v28 }
  0x9d   : > { %657 = vst [vmem:[%s1866_s24 + $0x90] sm:$0xff] %v625_v29 }
  0x9e   : > { %658 = vst [vmem:[%s1866_s24 + $0x98] sm:$0xff] %v626_v31 }
  0x9f   : > { %659 = vst [vmem:[%s1866_s24 + $0xa0] sm:$0xff] %v627_v32 }
  0xa0   : > { %660 = vst [vmem:[%s1866_s24 + $0xa8] sm:$0xff] %v628_v34 }
  0xa1   : > { %661 = vst [vmem:[%s1866_s24 + $0xb0] sm:$0xff] %v629_v35 }
  0xa2   : > { %662 = vst [vmem:[%s1866_s24 + $0xb8] sm:$0xff] %v630_v37 }
  0xa3   : > { %663 = vst [vmem:[%s1866_s24 + $0xc0] sm:$0xff] %v631_v38 }
  0xa4   : > { %664 = vst [vmem:[%s1866_s24 + $0xc8] sm:$0xff] %v632_v40 }
  0xa5   : > { %665 = vst [vmem:[%s1866_s24 + $0xd0] sm:$0xff] %v633_v41 }
  0xa6   : > { %666 = vst [vmem:[%s1866_s24 + $0xd8] sm:$0xff] %v634_v43 }
  0xa7   : > { %667 = vst [vmem:[%s1866_s24 + $0xe0] sm:$0xff] %v635_v44 }
  0xa8   : > { %668 = vst [vmem:[%s1866_s24 + $0xe8] sm:$0xff] %v636_v45 }
  0xa9   : > { %669 = vst [vmem:[%s1866_s24 + $0xf0] sm:$0xff] %v637_v46 }
  0xaa   : > { %670 = vst [vmem:[%s1866_s24 + $0xf8] sm:$0xff] %v638_v47 }
  0xab   : > { %1276 = shalt.err (!%p1273_p12)
}
  0xac   : > { %s1445_s24 = smov 128   ;;  %s1446_s9 = smov 8  }
  0xad   : > { %953 = dma.vmem_to_hbm [thread:$0]  (%p1654_p8), %s693_s6, 4096, %s695_s8, %s672_s1, %s1445_s24, %s1445_s24, %s1446_s9  }
  0xae   : > { %s677_s18 = scalar_lea.sflag [#allocation12], %s1724_s14  ;;  %s1291_s30 = sshra.s32 %s1954_s7, 4  ;;  %s1292_s30 = int_to_ptr.hbm [resolvable:$true] %s1291_s30 }
  0xaf   : > { %s1293_s0 = scalar_lea.hbm %s1292_s30, 256  ;;  %s1297_s13 = scalar_lea.hbm %s2109_s17, 1024 }
  0xb0   : > { %p1294_p1 = scmp.ne.s32.totalorder %s1292_s30, %s1293_s0  ;;  %p1298_p9 = scmp.lt.s32.totalorder %s1292_s30, %s2109_s17 }
  0xb1   : > { %p1299_p10 = scmp.lt.s32.totalorder %s1297_s13, %s1293_s0 }
  0xb2   : > { %p1295_p3 = pnand %p1294_p1, %p1654_p8 }
  0xb3   : > { %p1300_p13 = por %p1299_p10, %p1298_p9 }
  0xb4   : > { %p1296_p5 = pneg %p1295_p3 }
  0xb6   : > { %p1301_p4 = pnand %p1300_p13, %p1296_p5 }
  0xb8   : > { %1304 = shalt.err (!%p1301_p4)
}
  0xb9   : > { %954 = dma.vmem_to_hbm [thread:$0]  (%p1654_p8), %s1952_s10, 4096, %s1954_s7, %s677_s18, %s1445_s24, %s1445_s24, %s1446_s9  }
  0xba PF: > { %s2111_s14 = sld [smem:[#allocation27_spill]] }
  0xbb   : > { %s2112_s6 = sld [smem:[#allocation19_spill]] }
  0xc0   : > { %p978_p6 = scmp.ge.s32.totalorder %s2111_s14, 2 }
  0xc1   : > { %s729_s1 = sand.u32 1, %s2112_s6  }
  0xc2   : > { %p971_p7 = pnand %p978_p6, %p1664_p2  ;;  %s730_s21 = scalar_lea.sflag [#allocation4], %s729_s1 }
  0xc4   : > { %p972_p11 = pneg %p971_p7 }
  0xc6   : > { %1378 = dma.done.wait (%p972_p11), %s730_s21, 4096  }
  0xc7   : > { %1380 = vsyncadd (%p972_p11), %s730_s21, 4294963200  ;;  %s740_s19 = scalar_lea.sflag [#allocation12], %s729_s1 }
  0xc8   : > { %1382 = dma.done.wait (%p972_p11), %s740_s19, 4096  }
  0xc9   : > { %1384 = vsyncadd (%p972_p11), %s740_s19, 4294963200  ;;  %s31_s6 = sadd.s32 1, %s2111_s14   ;;  %s2115_s18 = sld [smem:[#allocation20_spill]] }
  0xca   : > { %p1987_p0 = scmp.ge.s32.totalorder %s31_s6, 6   ;;  %s2116_s19 = sld [smem:[#allocation21_spill]] }
  0xcb   : > { %s2117_s20 = sld [smem:[#allocation34_spill]]  ;;  %s2125_s22 = smov %s1407_s23 }
  0xcc   : > { %s2118_s21 = sld [smem:[#allocation22_spill]]  ;;  %s2127_s24 = smov %s1415_s25 }
  0xcd   : > { %s2119_s10 = sld [smem:[#allocation30_spill]]  ;;  %s2129_s27 = smov %s1431_s29 }
  0xce   : > { %s2120_s7 = sld [smem:[#allocation23_spill]] }
  0xcf   : > { %s2121_s26 = sld [smem:[#allocation33_spill]] }
  0xd0   : > { %s2122_s28 = sld [smem:[#allocation26_spill]] }
  0xd1   : > { %s2123_s11 = sld [smem:[#allocation28_spill]] }
  0xd2   : > { %s2124_s30 = sld [smem:[#allocation31_spill]] }
  0xd3   : > { %s2126_s23 = smov %s2119_s10  ;;  %30 = sbr.rel (!%p1987_p0) target bundleno = 21 (0x15), region = 135 }
  0xd4   : > { %s2128_s25 = smov %s2120_s7 }
  0xd7   : > { %s2130_s29 = smov %s2123_s11 }
  0xd8   :  { %746 = vsyncpa [#allocation3], 1 }
  0xd9   :  { %748 = vsyncpa [#allocation3 + $0x1], 1 }
  0xda   :  { %749 = vsyncpa [#allocation6], 1 }
  0xdb   :  { %751 = vsyncpa [#allocation6 + $0x1], 1 }
  0xdc   :  { %752 = vsyncpa [#allocation9], 1 }
  0xdd   :  { %754 = vsyncpa [#allocation9 + $0x1], 1 }
  0xde   :  { %755 = vsyncpa [#allocation4], 1 }
  0xdf   :  { %757 = vsyncpa [#allocation4 + $0x1], 1 }
  0xe0   :  { %758 = vsyncpa [#allocation12], 1 }
  0xe1   :  { %760 = vsyncpa [#allocation12 + $0x1], 1 }

</bundles_post_ra>
